<compile_context>
chip_gen: v5e
topology: v5e:2x2
jax: 0.10.0
libtpu: 0.0.40
codegen_flags: <defaults>
</compile_context>

<pallas_src>
import math

import jax
import jax.numpy as jnp
from jax.experimental import pallas as pl
from jax.experimental.pallas import tpu as pltpu


_TARGET_TILE_BYTES = 1 << 20  # ~1 MiB of x per grid step; with x/pe/mask/out double-
                              # buffered this stays well under the 16 MiB v5e default.


def _posenc_kernel(*refs):
    """refs = (x_ref, pe_ref[, mask_ref], o_ref).  Elementwise add (+ dropout)."""
    o_ref = refs[-1]
    x_ref, pe_ref = refs[0], refs[1]
    # Explicit f32 math (v5e VPU has no native bf16; on v6e/v7x this is a no-op).
    y = x_ref[...].astype(jnp.float32) + pe_ref[...].astype(jnp.float32)
    if len(refs) == 4:            # training-mode inverted dropout
        y = y * refs[2][...]      # mask is already scaled by 1/(1-p), f32
    o_ref[...] = y.astype(o_ref.dtype)


def make_positional_encoding_table(d_model, max_len, scale_factor=1.0,
                                   dtype=jnp.float32):
    """Deterministic buffer init, identical math to the PyTorch __init__."""
    position = jnp.arange(max_len, dtype=jnp.float32)[:, None]            # [L, 1]
    div_term = jnp.exp(jnp.arange(0, d_model, 2, dtype=jnp.float32)
                       * (-math.log(10000.0) / d_model))                  # [D/2]
    pe = jnp.zeros((max_len, d_model), dtype=jnp.float32)
    pe = pe.at[:, 0::2].set(jnp.sin(position * div_term))
    pe = pe.at[:, 1::2].set(jnp.cos(position * div_term))
    pe = scale_factor * pe[:, None, :]                                    # [L, 1, D]
    return pe.astype(dtype)


def positional_encoding(x, pe, *, dropout_rate=0.1, training=False, seed=0):
    """x: [S, B, D]; pe: [max_len, 1, D]; returns dropout(x + pe[:S]) as [S, B, D]."""
    S, B, D = x.shape
    pe_slice = pe[:S]                                  # pe[:x.size(0), :] in PyTorch
    apply_dropout = bool(training) and float(dropout_rate) > 0.0

    # ---- layout selection: present a lane-dense last dim to the output spec ----
    use_2d = (D % 128) != 0
    if use_2d:
        x_k = x.reshape(S, B * D)
        pe_k = jnp.broadcast_to(pe_slice, (S, B, D)).reshape(S, B * D)
        kshape = (S, B * D)
    else:
        x_k = x
        pe_k = pe_slice                                # broadcast over batch in-kernel
        kshape = (S, B, D)

    # ---- sequence-tile size (big tiles -> near HBM roofline) -------------------
    row_bytes = B * D * jnp.dtype(x.dtype).itemsize
    ts = min(int(max(1, _TARGET_TILE_BYTES // row_bytes)), S)
    if use_2d and ts < S:
        # second-to-last block dim must be a multiple of 8 (or the full extent)
        ts = min(max(8, (ts // 8) * 8), S)
    grid = (pl.cdiv(S, ts),)

    if use_2d:
        x_spec = pl.BlockSpec((ts, B * D), lambda i: (i, 0))
        pe_spec = pl.BlockSpec((ts, B * D), lambda i: (i, 0))
        mask_spec = pl.BlockSpec((ts, B * D), lambda i: (i, 0))
        out_spec = pl.BlockSpec((ts, B * D), lambda i: (i, 0))
    else:
        x_spec = pl.BlockSpec((ts, B, D), lambda i: (i, 0, 0))
        pe_spec = pl.BlockSpec((ts, 1, D), lambda i: (i, 0, 0))
        mask_spec = pl.BlockSpec((ts, B, D), lambda i: (i, 0, 0))
        out_spec = pl.BlockSpec((ts, B, D), lambda i: (i, 0, 0))

    in_specs = [x_spec, pe_spec]
    operands = [x_k, pe_k]

    if apply_dropout:
        # Inverted-dropout keep-mask, pre-scaled by 1/(1-p), generated with the
        # host-side JAX PRNG (different but statistically equivalent stream vs
        # torch.nn.Dropout).
        # TODO(synk): an in-kernel pltpu.prng_random_bits mask would avoid
        # streaming these bytes, but that primitive has no interpret-mode lowering.
        rate = float(dropout_rate)
        if rate >= 1.0:
            mask = jnp.zeros(kshape, jnp.float32)
        else:
            keep = jax.random.bernoulli(jax.random.PRNGKey(seed), 1.0 - rate, kshape)
            mask = keep.astype(jnp.float32) * jnp.float32(1.0 / (1.0 - rate))
        in_specs.append(mask_spec)
        operands.append(mask)

    out = pl.pallas_call(
        _posenc_kernel,
        out_shape=jax.ShapeDtypeStruct(kshape, x.dtype),
        grid=grid,
        in_specs=in_specs,
        out_specs=out_spec,
        compiler_params=pltpu.CompilerParams(
            dimension_semantics=("parallel",),        # independent blocks -> megacore
            vmem_limit_bytes=32 * 1024 * 1024,
        ),
    )(*operands)

    return out.reshape(S, B, D) if use_2d else out


if __name__ == "__main__":
    # Small shapes consistent with the module's forward: [seq, batch, d_model].
    d_model, max_len = 32, 16
    seq_len, batch = 8, 2
    dropout_p = 0.1

    key = jax.random.PRNGKey(0)
    x = jax.random.normal(key, (seq_len, batch, d_model), dtype=jnp.float32)
    pe = make_positional_encoding_table(d_model, max_len, scale_factor=1.0)

    ref = x + pe[:seq_len]                            # broadcast over batch

    # Eval mode (dropout is identity): must match the plain-JAX reference.
    out_eval = jax.block_until_ready(
        positional_encoding(x, pe, dropout_rate=dropout_p, training=False))
    assert out_eval.shape == (seq_len, batch, d_model)
    assert jnp.allclose(out_eval, ref, atol=1e-6, rtol=1e-6)

    # Training mode: inverted dropout -> every element is 0 or ref/(1-p).
    out_train = jax.block_until_ready(
        positional_encoding(x, pe, dropout_rate=dropout_p, training=True, seed=0))
    assert out_train.shape == (seq_len, batch, d_model)
    scaled = ref / (1.0 - dropout_p)
    is_zero = jnp.abs(out_train) < 1e-6
    is_kept = jnp.abs(out_train - scaled) < 1e-4
    assert bool(jnp.all(is_zero | is_kept))

    print("KERNEL_OK")
</pallas_src>

<mosaic_0001>
module attributes {stable_mosaic.version = 11 : i64} {
  func.func @_posenc_kernel(%arg0: i32, %arg1: memref<8x64xf32, #tpu.memory_space<vmem>>, %arg2: memref<8x64xf32, #tpu.memory_space<vmem>>, %arg3: memref<8x64xf32, #tpu.memory_space<vmem>>) attributes {dimension_semantics = [#tpu.dimension_semantics<parallel>], iteration_bounds = array<i64: 1>, scalar_prefetch = 0 : i64, scratch_operands = 0 : i64, tpu.core_type = #tpu.core_type<tc>, window_params = [{transform_indices = @transform_0, window_bounds = array<i64: 8, 64>}, {transform_indices = @transform_1, window_bounds = array<i64: 8, 64>}, {transform_indices = @transform_2, window_bounds = array<i64: 8, 64>}]} {
    %c0 = arith.constant 0 : index
    %c0_0 = arith.constant 0 : index
    %0 = vector.load %arg1[%c0, %c0_0] : memref<8x64xf32, #tpu.memory_space<vmem>>, vector<8x64xf32>
    %c0_1 = arith.constant 0 : index
    %c0_2 = arith.constant 0 : index
    %1 = vector.load %arg2[%c0_1, %c0_2] : memref<8x64xf32, #tpu.memory_space<vmem>>, vector<8x64xf32>
    %2 = arith.addf %0, %1 : vector<8x64xf32>
    %c0_3 = arith.constant 0 : index
    %c0_4 = arith.constant 0 : index
    %3 = vector.load %arg3[%c0_3, %c0_4] : memref<8x64xf32, #tpu.memory_space<vmem>>, vector<8x64xf32>
    tpu.vector_store %arg3[%c0_3, %c0_4], %2 {strides = array<i32>} : memref<8x64xf32, #tpu.memory_space<vmem>>, vector<8x64xf32>,
    return
  }
  func.func @transform_0(%arg0: i32) -> (i32, i32) {
    %c0_i32 = arith.constant 0 : i32
    %c0_i32_0 = arith.constant 0 : i32
    return %arg0, %c0_i32 : i32, i32
  }
  func.func @transform_1(%arg0: i32) -> (i32, i32) {
    %c0_i32 = arith.constant 0 : i32
    %c0_i32_0 = arith.constant 0 : i32
    return %arg0, %c0_i32 : i32, i32
  }
  func.func @transform_2(%arg0: i32) -> (i32, i32) {
    %c0_i32 = arith.constant 0 : i32
    %c0_i32_0 = arith.constant 0 : i32
    return %arg0, %c0_i32 : i32, i32
  }
}

</mosaic_0001>

<bundles_post_ra>
// kernel: tpu_custom_call.1
= control target key start
LH: loop header
LB: loop body
LE: loop exit
PB: predicated region body
PF: predicated region fallthrough
CT: control target
= control target key end

     0   :  { %7 = vsyncpa [#allocation3], 0  ;;  %s171_s0 = inlined_call_operand.hbm [shape: f32[8,64], index: 0, kind: input, shape index: {}]   ;;  %s172_s1 = inlined_call_operand.hbm [shape: f32[8,64], index: 1, kind: input, shape index: {}]   ;;  %s173_s2 = inlined_call_operand.hbm [shape: f32[8,64], index: 2, kind: output, shape index: {}]  }
   0x1   :  { %8 = vsyncpa [#allocation6], 0 }
   0x2   :  { %9 = vsyncpa [#allocation4], 0  ;;  %s15_s11 = sshll.u32 %s171_s0, 4  ;;  %s144_s12 = smov [#allocation2]   ;;  %s16_s11 = int_to_ptr.hbm [resolvable:$true] %s15_s11 }
   0x3   :  { %s17_s13 = sshll.u32 %s144_s12, 4  ;;  %s26_s16 = sshll.u32 %s172_s1, 4  ;;  %s18_s13 = int_to_ptr.vmem [resolvable:$true] %s17_s13  ;;  %s27_s16 = int_to_ptr.hbm [resolvable:$true] %s26_s16 }
   0x4   :  { %20 = dma.hbm_to_vmem [thread:$0]  %s16_s11, 128, %s18_s13, [#allocation3]  }
   0x5   :  { %s145_s17 = smov [#allocation5]  }
   0x6   :  { %s28_s18 = sshll.u32 %s145_s17, 4  ;;  %s29_s18 = int_to_ptr.vmem [resolvable:$true] %s28_s18 }
   0x7   :  { %31 = dma.hbm_to_vmem [thread:$0]  %s27_s16, 128, %s29_s18, [#allocation6]  }
   0x8   :  { %138 = dma.done.wait [#allocation3], 128  }
   0x9   :  { %139 = vsyncadd [#allocation3], 4294967168 }
   0xa   :  { %140 = dma.done.wait [#allocation6], 128  }
   0xb   :  { %141 = vsyncadd [#allocation6], 4294967168  ;;  %s146_s19 = smov [#allocation7]   ;;  %s52_s22 = sshll.u32 %s173_s2, 4  ;;  %v40_v0 = vld [vmem:[#allocation2] sm:$0xff]  ;;  %v41_v1 = vld [vmem:[#allocation5] sm:$0xff]  ;;  %s53_s22 = int_to_ptr.hbm [resolvable:$true] %s52_s22 }
   0xc   :  { %s50_s0 = sshll.u32 %s146_s19, 4  ;;  %vm43_vm0 = vcmask 523264   ;;  %v42_v2 = vadd.f32 %v41_v1, %v40_v0  ;;  %s51_s0 = int_to_ptr.vmem [resolvable:$true] %s50_s0 }
   0xe   :  { %44 = vst.msk [vmem:[#allocation7] sm:$0xff] %vm43_vm0, %v42_v2 }
   0xf   :  { %55 = dma.vmem_to_hbm [thread:$0]  %s51_s0, 128, %s53_s22, [#allocation4]  }
  0x10   :  { %142 = dma.done.wait [#allocation4], 128  }
  0x11   :  { %143 = vsyncadd [#allocation4], 4294967168 }
  0x12   :  { %60 = vsyncpa [#allocation3], 1 }
  0x13   :  { %61 = vsyncpa [#allocation6], 1 }
  0x14   :  { %62 = vsyncpa [#allocation4], 1 }

</bundles_post_ra>
